<compile_context>
chip_gen: v6e
topology: v6e:2x2x1
jax: 0.10.0
libtpu: 0.0.40
codegen_flags: <defaults>
</compile_context>

<pallas_src>
import functools
import math

import jax
import jax.numpy as jnp
import numpy as np
from jax import lax
from jax.experimental import pallas as pl
from jax.experimental.pallas import tpu as pltpu

_HALF_PI = 0.5 * math.pi
_MAX_BLOCK_ELEMS = 1 << 20          # ~4 MiB of f32 per block
_MIN_ELEMS_FOR_SPLIT = 256 * 1024   # only force >=2 grid steps for "real" sizes
_VMEM_LIMIT_BYTES = 48 * 1024 * 1024

_PARAMS_2D = pltpu.CompilerParams(
    dimension_semantics=("parallel", "parallel"),
    vmem_limit_bytes=_VMEM_LIMIT_BYTES)
_PARAMS_1D = pltpu.CompilerParams(
    dimension_semantics=("parallel",),
    vmem_limit_bytes=_VMEM_LIMIT_BYTES)


# --------------------------------------------------------------------------------------
# Host-side constant rows
# --------------------------------------------------------------------------------------
def _freq_phase_f64(D):
    """Per-channel inverse frequency and sin-phase (cos(x) = sin(x + pi/2))."""
    idx = np.arange(D, dtype=np.float64)
    inv_freq = np.power(10000.0, -2.0 * np.floor(idx / 2.0) / D)        # (D,)
    phase = (np.arange(D, dtype=np.int64) % 2).astype(np.float64) * (0.5 * np.pi)
    return inv_freq, phase


def _freq_phase_rows(D):
    inv_freq, phase = _freq_phase_f64(D)
    return (jnp.asarray(inv_freq.astype(np.float32))[None],             # (1, D)
            jnp.asarray(phase.astype(np.float32))[None])                # (1, D)


def _flat_rows(D, lt):
    """(1, lt*D) rows so that emb = sin(seq_off * row_a + row_b) for one seq tile."""
    inv_freq, phase = _freq_phase_f64(D)
    pos = np.repeat(np.arange(lt, dtype=np.float64), D)                 # (lt*D,)
    row_a = np.tile(inv_freq, lt)                                       # freq per lane
    row_b = pos * row_a + np.tile(phase, lt)                            # local theta
    return (jnp.asarray(row_a.astype(np.float32))[None],
            jnp.asarray(row_b.astype(np.float32))[None])


# --------------------------------------------------------------------------------------
# Kernels — lane-dense flattened layout (D < 128): blocks are (bt, lt*D)
# --------------------------------------------------------------------------------------
def _merge_flat_kernel(row_a_ref, row_b_ref, x_ref, o_ref, *, seq_tile, merge_mode):
    seq_off = (pl.program_id(1) * seq_tile).astype(jnp.float32)
    emb = jnp.sin(seq_off * row_a_ref[...] + row_b_ref[...])     # (1, lt*D), single sin
    x = x_ref[...]
    if merge_mode == "add":
        o_ref[...] = (x + emb).astype(o_ref.dtype)
    else:  # "mul"
        o_ref[...] = (x * (emb + 1.0)).astype(o_ref.dtype)


def _zero_flat_kernel(row_a_ref, row_b_ref, o_ref, *, seq_tile):
    seq_off = (pl.program_id(0) * seq_tile).astype(jnp.float32)
    o_ref[...] = jnp.sin(seq_off * row_a_ref[...] + row_b_ref[...]).astype(o_ref.dtype)


# --------------------------------------------------------------------------------------
# Kernels — 3-D blocked layout (D >= 128 or flattened fallback): blocks are (bt, lt, D)
# --------------------------------------------------------------------------------------
def _merge_3d_kernel(freq_ref, phase_ref, x_ref, o_ref, *, seq_tile, merge_mode):
    _, lt, _ = o_ref.shape
    seq_off = pl.program_id(1) * seq_tile
    pos = (lax.broadcasted_iota(jnp.int32, (lt, 1), 0) + seq_off).astype(jnp.float32)
    emb = jnp.sin(pos * freq_ref[...] + phase_ref[...])          # (lt, D), single sin
    x = x_ref[...]
    if merge_mode == "add":
        o_ref[...] = (x + emb[None]).astype(o_ref.dtype)
    else:  # "mul"
        o_ref[...] = (x * (emb[None] + 1.0)).astype(o_ref.dtype)


def _zero_3d_kernel(freq_ref, phase_ref, o_ref, *, seq_tile):
    _, lt, _ = o_ref.shape
    seq_off = pl.program_id(0) * seq_tile
    pos = (lax.broadcasted_iota(jnp.int32, (lt, 1), 0) + seq_off).astype(jnp.float32)
    o_ref[...] = jnp.sin(pos * freq_ref[...] + phase_ref[...])[None].astype(o_ref.dtype)


# --------------------------------------------------------------------------------------
# Tile-selection helpers
# --------------------------------------------------------------------------------------
def _round_down(x, m):
    return (x // m) * m


def _largest_divisor(n, cap, multiple_of=1):
    cap = min(n, cap)
    for d in range(cap, 0, -1):
        if n % d == 0 and d % multiple_of == 0:
            return d
    return None


def _choose_seq_tile(L, cap, mult):
    """Seq tile (multiple of `mult`, or the full length) and padded length Lp."""
    cap = max(mult, cap)
    if L <= cap:
        return L, L                                   # full-length tile is always legal
    d = _largest_divisor(L, cap, mult)
    if d is not None and 4 * d >= min(cap, L):
        return d, L                                   # good divisor, no padding needed
    lt = max(mult, _round_down(cap, mult))
    Lp = ((L + lt - 1) // lt) * lt                    # pad seq, slice output afterwards
    return lt, Lp


# --------------------------------------------------------------------------------------
# Forward paths
# --------------------------------------------------------------------------------------
def _merge_forward_flat(inputs, B, L, D, merge_mode, total):
    lane_mult = 128 // math.gcd(D, 128)
    bt_target = min(B, 4)                             # amortize emb compute over batch
    lt, Lp = _choose_seq_tile(
        L, max(lane_mult, (_MAX_BLOCK_ELEMS // bt_target) // D), lane_mult)

    bt_cap = max(1, _MAX_BLOCK_ELEMS // (lt * D))
    if B <= bt_cap:
        bt = B                                        # full batch dim (always legal)
    else:
        bt = _largest_divisor(B, bt_cap, 8)           # 2-D block: 2nd-to-last dim rule
        if bt is None:
            return None                               # fall back to 3-D blocked layout

    # Guarantee >=2 grid steps for large single-block shapes (v7x has 2 TensorCores).
    if (B // bt) * (Lp // lt) == 1 and total >= _MIN_ELEMS_FOR_SPLIT:
        if Lp % (2 * lane_mult) == 0:
            lt = Lp // 2
        elif B % 2 == 0 and (B // 2) % 8 == 0:
            bt = B // 2

    x = inputs
    if Lp != L:
        x = jnp.pad(x, ((0, 0), (0, Lp - L), (0, 0)))
    x2 = x.reshape(B, Lp * D)                         # lane-dense: channels*seq on lanes
    row_a, row_b = _flat_rows(D, lt)
    width = lt * D

    kernel = functools.partial(_merge_flat_kernel, seq_tile=lt, merge_mode=merge_mode)
    out2 = pl.pallas_call(
        kernel,
        grid=(B // bt, Lp // lt),
        in_specs=[pl.BlockSpec((1, width), lambda i, j: (0, 0)),
                  pl.BlockSpec((1, width), lambda i, j: (0, 0)),
                  pl.BlockSpec((bt, width), lambda i, j: (i, j))],
        out_specs=pl.BlockSpec((bt, width), lambda i, j: (i, j)),
        out_shape=jax.ShapeDtypeStruct((B, Lp * D), inputs.dtype),
        compiler_params=_PARAMS_2D,
    )(row_a, row_b, x2)

    out = out2.reshape(B, Lp, D)
    return out[:, :L] if Lp != L else out


def _merge_forward_3d(inputs, B, L, D, merge_mode, total):
    bt_target = min(B, 4)
    lt_cap = max(8, _round_down(max(8, (_MAX_BLOCK_ELEMS // bt_target) // D), 8))
    lt, Lp = _choose_seq_tile(L, lt_cap, 8)
    bt = _largest_divisor(B, max(1, _MAX_BLOCK_ELEMS // (lt * D)), 1) or 1

    if (B // bt) * (Lp // lt) == 1 and total >= _MIN_ELEMS_FOR_SPLIT:
        if B >= 2:
            bt = _largest_divisor(B, max(1, B // 2), 1) or 1
        elif Lp % 16 == 0:
            lt = Lp // 2

    x = inputs
    if Lp != L:
        x = jnp.pad(x, ((0, 0), (0, Lp - L), (0, 0)))
    freq, phase = _freq_phase_rows(D)

    kernel = functools.partial(_merge_3d_kernel, seq_tile=lt, merge_mode=merge_mode)
    out = pl.pallas_call(
        kernel,
        grid=(B // bt, Lp // lt),
        in_specs=[pl.BlockSpec((1, D), lambda i, j: (0, 0)),
                  pl.BlockSpec((1, D), lambda i, j: (0, 0)),
                  pl.BlockSpec((bt, lt, D), lambda i, j: (i, j, 0))],
        out_specs=pl.BlockSpec((bt, lt, D), lambda i, j: (i, j, 0)),
        out_shape=jax.ShapeDtypeStruct((B, Lp, D), inputs.dtype),
        compiler_params=_PARAMS_2D,
    )(freq, phase, x)
    return out[:, :L] if Lp != L else out


def _zero_forward(L, D):
    if D < 128:
        lane_mult = 128 // math.gcd(D, 128)
        lt, Lp = _choose_seq_tile(L, max(lane_mult, _MAX_BLOCK_ELEMS // D), lane_mult)
        if Lp // lt == 1 and L * D >= _MIN_ELEMS_FOR_SPLIT and Lp % (2 * lane_mult) == 0:
            lt = Lp // 2
        row_a, row_b = _flat_rows(D, lt)
        width = lt * D
        kernel = functools.partial(_zero_flat_kernel, seq_tile=lt)
        out2 = pl.pallas_call(
            kernel,
            grid=(Lp // lt,),
            in_specs=[pl.BlockSpec((1, width), lambda j: (0, 0)),
                      pl.BlockSpec((1, width), lambda j: (0, 0))],
            out_specs=pl.BlockSpec((1, width), lambda j: (0, j)),
            out_shape=jax.ShapeDtypeStruct((1, Lp * D), jnp.float32),
            compiler_params=_PARAMS_1D,
        )(row_a, row_b)
        out = out2.reshape(1, Lp, D)
        return out[:, :L] if Lp != L else out

    lt_cap = max(8, _round_down(max(8, _MAX_BLOCK_ELEMS // D), 8))
    lt, Lp = _choose_seq_tile(L, lt_cap, 8)
    if Lp // lt == 1 and L * D >= _MIN_ELEMS_FOR_SPLIT and Lp % 16 == 0:
        lt = Lp // 2
    freq, phase = _freq_phase_rows(D)
    kernel = functools.partial(_zero_3d_kernel, seq_tile=lt)
    out = pl.pallas_call(
        kernel,
        grid=(Lp // lt,),
        in_specs=[pl.BlockSpec((1, D), lambda j: (0, 0)),
                  pl.BlockSpec((1, D), lambda j: (0, 0))],
        out_specs=pl.BlockSpec((1, lt, D), lambda j: (0, j, 0)),
        out_shape=jax.ShapeDtypeStruct((1, Lp, D), jnp.float32),
        compiler_params=_PARAMS_1D,
    )(freq, phase)
    return out[:, :L] if Lp != L else out


# --------------------------------------------------------------------------------------
# Public wrapper (mirrors SinusoidalPositionEmbedding.forward)
# --------------------------------------------------------------------------------------
def sinusoidal_position_embedding(inputs, output_dim, merge_mode="add"):
    """Pallas forward of SinusoidalPositionEmbedding.

    inputs: (B, L, output_dim) for merge_mode in {'add', 'mul'};
            for 'zero' only inputs.shape[:2] are used and the (1, L, output_dim)
            embedding table is returned (same as the PyTorch module).
    """
    B, L = int(inputs.shape[0]), int(inputs.shape[1])
    D = int(output_dim)
    assert D % 2 == 0, "output_dim must be even"

    if merge_mode == "zero":
        return _zero_forward(L, D)

    assert merge_mode in ("add", "mul"), merge_mode
    assert int(inputs.shape[2]) == D, "output_dim must match the channel dim for add/mul"
    total = B * L * D

    if D < 128:
        out = _merge_forward_flat(inputs, B, L, D, merge_mode, total)
        if out is not None:
            return out
    return _merge_forward_3d(inputs, B, L, D, merge_mode, total)


# --------------------------------------------------------------------------------------
# Pure-JAX reference mirroring the PyTorch forward
# --------------------------------------------------------------------------------------
def reference_forward(inputs, output_dim, merge_mode="add"):
    L = inputs.shape[1]
    pos = jnp.arange(L, dtype=jnp.float32)[None]                        # (1, L)
    idx = jnp.arange(output_dim // 2, dtype=jnp.float32)
    idx = jnp.power(10000.0, -2.0 * idx / output_dim)
    emb = jnp.einsum("bn,d->bnd", pos, idx)                             # (1, L, D/2)
    emb = jnp.stack([jnp.sin(emb), jnp.cos(emb)], axis=-1)              # (1, L, D/2, 2)
    emb = jnp.reshape(emb, (-1, L, output_dim))                         # (1, L, D)
    if merge_mode == "add":
        return inputs + emb
    elif merge_mode == "mul":
        return inputs * (emb + 1.0)
    else:  # 'zero'
        return emb


# --------------------------------------------------------------------------------------
# Demo / self-check
# --------------------------------------------------------------------------------------
if __name__ == "__main__":
    key = jax.random.PRNGKey(0)

    # Small shapes exercising both layouts: lane-dense flattened (D=32) and 3-D (D=128).
    for (B, L, D) in [(2, 8, 32), (2, 16, 128)]:
        x = jax.random.normal(jax.random.fold_in(key, D), (B, L, D), jnp.float32)
        for mode in ("add", "mul", "zero"):
            out = sinusoidal_position_embedding(x, D, merge_mode=mode)
            out = jax.block_until_ready(out)
            ref = reference_forward(x, D, merge_mode=mode)
            assert out.shape == ref.shape, (mode, out.shape, ref.shape)
            assert np.allclose(np.asarray(out), np.asarray(ref),
                               atol=1e-5, rtol=1e-5), (mode, B, L, D)

    print("KERNEL_OK")
</pallas_src>

<mosaic_0001>
module attributes {stable_mosaic.version = 11 : i64} {
  func.func @_merge_flat_kernel(%arg0: i32, %arg1: i32, %arg2: memref<1x256xf32, #tpu.memory_space<vmem>>, %arg3: memref<1x256xf32, #tpu.memory_space<vmem>>, %arg4: memref<2x256xf32, #tpu.memory_space<vmem>>, %arg5: memref<2x256xf32, #tpu.memory_space<vmem>>) attributes {dimension_semantics = [#tpu.dimension_semantics<parallel>, #tpu.dimension_semantics<parallel>], iteration_bounds = array<i64: 1, 1>, scalar_prefetch = 0 : i64, scratch_operands = 0 : i64, tpu.core_type = #tpu.core_type<tc>, window_params = [{pipeline_mode = #tpu.pipeline_mode<synchronous>, transform_indices = @transform_0, window_bounds = array<i64: 1, 256>}, {pipeline_mode = #tpu.pipeline_mode<synchronous>, transform_indices = @transform_1, window_bounds = array<i64: 1, 256>}, {transform_indices = @transform_2, window_bounds = array<i64: 2, 256>}, {transform_indices = @transform_3, window_bounds = array<i64: 2, 256>}]} {
    %c8_i32 = arith.constant 8 : i32
    %0 = arith.muli %arg1, %c8_i32 : i32
    %1 = arith.sitofp %0 : i32 to f32
    %c0 = arith.constant 0 : index
    %c0_0 = arith.constant 0 : index
    %2 = vector.load %arg2[%c0, %c0_0] : memref<1x256xf32, #tpu.memory_space<vmem>>, vector<1x256xf32>
    %3 = vector.broadcast %1 : f32 to vector<1x256xf32>
    %4 = arith.mulf %3, %2 : vector<1x256xf32>
    %c0_1 = arith.constant 0 : index
    %c0_2 = arith.constant 0 : index
    %5 = vector.load %arg3[%c0_1, %c0_2] : memref<1x256xf32, #tpu.memory_space<vmem>>, vector<1x256xf32>
    %6 = arith.addf %4, %5 : vector<1x256xf32>
    %7 = math.sin %6 : vector<1x256xf32>
    %c0_3 = arith.constant 0 : index
    %c0_4 = arith.constant 0 : index
    %8 = vector.load %arg4[%c0_3, %c0_4] : memref<2x256xf32, #tpu.memory_space<vmem>>, vector<2x256xf32>
    %9 = vector.broadcast %7 : vector<1x256xf32> to vector<2x256xf32>
    %10 = arith.addf %8, %9 : vector<2x256xf32>
    %c0_5 = arith.constant 0 : index
    %c0_6 = arith.constant 0 : index
    %11 = vector.load %arg5[%c0_5, %c0_6] : memref<2x256xf32, #tpu.memory_space<vmem>>, vector<2x256xf32>
    tpu.vector_store %arg5[%c0_5, %c0_6], %10 {strides = array<i32>} : memref<2x256xf32, #tpu.memory_space<vmem>>, vector<2x256xf32>,
    return
  }
  func.func @transform_0(%arg0: i32, %arg1: i32) -> (i32, i32) {
    %c0_i32 = arith.constant 0 : i32
    %c0_i32_0 = arith.constant 0 : i32
    %c0_i32_1 = arith.constant 0 : i32
    return %c0_i32, %c0_i32_0 : i32, i32
  }
  func.func @transform_1(%arg0: i32, %arg1: i32) -> (i32, i32) {
    %c0_i32 = arith.constant 0 : i32
    %c0_i32_0 = arith.constant 0 : i32
    %c0_i32_1 = arith.constant 0 : i32
    return %c0_i32, %c0_i32_0 : i32, i32
  }
  func.func @transform_2(%arg0: i32, %arg1: i32) -> (i32, i32) {
    %c0_i32 = arith.constant 0 : i32
    return %arg0, %arg1 : i32, i32
  }
  func.func @transform_3(%arg0: i32, %arg1: i32) -> (i32, i32) {
    %c0_i32 = arith.constant 0 : i32
    return %arg0, %arg1 : i32, i32
  }
}

</mosaic_0001>

<bundles_post_ra>
// kernel: tpu_custom_call.1
= control target key start
LH: loop header
LB: loop body
LE: loop exit
PB: predicated region body
PF: predicated region fallthrough
CT: control target
= control target key end

     0   :  { %8 = vsyncpa [#allocation3], 0  ;;  %s371_s0 = inlined_call_operand.hbm [shape: f32[1,256], index: 0, kind: input, shape index: {}]   ;;  %s372_s1 = inlined_call_operand.hbm [shape: f32[1,256], index: 1, kind: input, shape index: {}]   ;;  %s373_s2 = inlined_call_operand.hbm [shape: f32[2,256], index: 2, kind: input, shape index: {}]   ;;  %s374_s3 = inlined_call_operand.hbm [shape: f32[2,256], index: 3, kind: output, shape index: {}]  }
   0x1   :  { %9 = vsyncpa [#allocation6], 0 }
   0x2   :  { %10 = vsyncpa [#allocation4], 0  ;;  %s307_s12 = smov [#allocation5]   ;;  %s308_s14 = smov [#allocation2]  }
   0x3   :  { %s27_s13 = sshll.u32 %s307_s12, 4  ;;  %s17_s15 = sshll.u32 %s308_s14, 4  ;;  %s28_s13 = int_to_ptr.vmem [resolvable:$true] %s27_s13  ;;  %s18_s15 = int_to_ptr.vmem [resolvable:$true] %s17_s15 }
   0x4   :  { %s229_s16 = scalar_lea.vmem %s28_s13, 32  ;;  %p234_p1 = scmp.lt.s32.totalorder %s28_s13, %s28_s13 }
   0x5   :  { %p230_p0 = scmp.ne.s32.totalorder %s28_s13, %s229_s16  ;;  %p235_p2 = scmp.lt.s32.totalorder %s229_s16, %s229_s16 }
   0x7   :  { %p236_p3 = por %p235_p2, %p234_p1 }
   0x9   :  { %p237_p4 = pnand %p236_p3, %p230_p0 }
   0xb   :  { %240 = shalt.err (!%p237_p4)
}
   0xc   :  { %30 = dma.hbm_to_vmem [thread:$0]  %s372_s1, 32, %s28_s13, [#allocation6]  }
   0xd   :  { %s249_s19 = scalar_lea.vmem %s18_s15, 32  ;;  %p254_p6 = scmp.lt.s32.totalorder %s18_s15, %s18_s15 }
   0xe   :  { %p250_p5 = scmp.ne.s32.totalorder %s18_s15, %s249_s19  ;;  %p255_p7 = scmp.lt.s32.totalorder %s249_s19, %s249_s19 }
  0x10   :  { %p256_p8 = por %p255_p7, %p254_p6 }
  0x12   :  { %p257_p9 = pnand %p256_p8, %p250_p5 }
  0x14   :  { %260 = shalt.err (!%p257_p9)
}
  0x15   :  { %20 = dma.hbm_to_vmem [thread:$0]  %s371_s0, 32, %s18_s15, [#allocation3]  }
  0x16   :  { %s309_s22 = smov [#allocation7]  }
  0x17   :  { %s37_s23 = sshll.u32 %s309_s22, 4  ;;  %s38_s23 = int_to_ptr.vmem [resolvable:$true] %s37_s23 }
  0x18   :  { %s269_s24 = scalar_lea.vmem %s38_s23, 64  ;;  %p274_p11 = scmp.lt.s32.totalorder %s38_s23, %s38_s23 }
  0x19   :  { %p270_p10 = scmp.ne.s32.totalorder %s38_s23, %s269_s24  ;;  %p275_p12 = scmp.lt.s32.totalorder %s269_s24, %s269_s24 }
  0x1b   :  { %p276_p13 = por %p275_p12, %p274_p11 }
  0x1d   :  { %p277_p0 = pnand %p276_p13, %p270_p10 }
  0x1f   :  { %280 = shalt.err (!%p277_p0)
}
  0x20   :  { %40 = dma.hbm_to_vmem [thread:$0]  %s373_s2, 64, %s38_s23, [#allocation6]  }
  0x21   :  { %301 = dma.done.wait [#allocation3], 32  }
  0x22   :  { %302 = vsyncadd [#allocation3], 4294967264 }
  0x23   :  { %303 = dma.done.wait [#allocation6], 96  }
  0x24   :  { %304 = vsyncadd [#allocation6], 4294967200  ;;  %v52_v0 = vld [vmem:[#allocation2] sm:$0x3]  ;;  %v55_v1 = vld [vmem:[#allocation5] sm:$0x3] }
  0x25   :  { %v54_v2 = vmul.f32 0.0, %v52_v0  ;;  %v310_v15 = vmov 683565275   ;;  %v311_v17 = vmov 2475754826   ;;  %s317_s0 = smov [#allocation8]  }
  0x26   :  { %v312_v19 = vmov 2131351028   ;;  %v313_v21 = vmov 2102212464   ;;  %v314_v23 = vmov 920167782  }
  0x27   :  { %v347_v3 = vadd.f32 %v55_v1, %v54_v2  ;;  %v315_v30 = vmov 1326507024   ;;  %s188_s2 = sshll.u32 %s317_s0, 4  ;;  %s189_s2 = int_to_ptr.vmem [resolvable:$true] %s188_s2 }
  0x28   :  { %s281_s26 = scalar_lea.vmem %s189_s2, 64  ;;  %p286_p2 = scmp.lt.s32.totalorder %s189_s2, %s189_s2 }
  0x29   :  { %v60_v4 = vand.u32 2139095040, %v347_v3  ;;  %v57_v6 = vand.u32 2147483647, %v347_v3  ;;  %vm59_vm7 = vcmp.lt.s32.totalorder %v347_v3, 0  ;;  %vm149_vm12 = vweird.f32 %v347_v3  ;;  %p282_p1 = scmp.ne.s32.totalorder %s189_s2, %s281_s26  ;;  %p287_p3 = scmp.lt.s32.totalorder %s281_s26, %s281_s26 }
  0x2b   :  { %v61_v5 = vshrl.u32 %v60_v4, 23  ;;  %v64_v9 = vand.u32 8388607, %v57_v6  ;;  %vm58_vm8 = vcmp.le.f32.partialorder %v57_v6, 0.7853982  ;;  %p288_p4 = por %p287_p3, %p286_p2 }
  0x2d   :  { %v198_v7 = vadd.s32 4294967169, %v61_v5  ;;  %v65_v12 = vor.u32 8388608, %v64_v9  ;;  %p289_p5 = pnand %p288_p4, %p282_p1 }
  0x2f   :  { %v67_v8 = vadd.s32 1, %v198_v7  ;;  %v105_v32 = vshll.u32 %v65_v12, 8 }
  0x31   :  { %vm68_vm0 = vcmp.gt.s32.totalorder %v67_v8, 0 }
  0x32   :  { %v69_v10 = vsel %vm68_vm0, %v67_v8, 0 }
  0x33   :  { %v71_v11 = vand.u32 31, %v69_v10  ;;  %v70_v13 = vshrl.u32 %v69_v10, 5 }
  0x35   :  { %v72_v14 = vsub.s32 32, %v71_v11  ;;  %v74_v16 = vshll.u32 %v310_v15, %v71_v11  ;;  %v77_v18 = vshll.u32 %v311_v17, %v71_v11  ;;  %v80_v20 = vshll.u32 %v312_v19, %v71_v11 }
  0x36   :  { %v83_v22 = vshll.u32 %v313_v21, %v71_v11  ;;  %v86_v24 = vshll.u32 %v314_v23, %v71_v11  ;;  %vm89_vm1 = vcmp.lt.s32.totalorder %v70_v13, 1  ;;  %vm92_vm2 = vcmp.lt.s32.totalorder %v70_v13, 4 }
  0x37   :  { %v73_v25 = vshrl.u32 %v310_v15, %v72_v14  ;;  %v75_v26 = vshrl.u32 %v311_v17, %v72_v14  ;;  %v78_v27 = vshrl.u32 %v312_v19, %v72_v14  ;;  %v81_v28 = vshrl.u32 %v313_v21, %v72_v14 }
  0x38   :  { %v84_v29 = vshrl.u32 %v314_v23, %v72_v14  ;;  %v87_v31 = vshrl.u32 %v315_v30, %v72_v14  ;;  %vm90_vm3 = vcmp.lt.s32.totalorder %v70_v13, 2  ;;  %vm91_vm4 = vcmp.lt.s32.totalorder %v70_v13, 3 }
  0x39   :  { %v76_v33 = vor.u32 %v75_v26, %v74_v16  ;;  %v79_v34 = vor.u32 %v78_v27, %v77_v18  ;;  %v82_v35 = vor.u32 %v81_v28, %v80_v20  ;;  %v316_v27 = vmov 1983009808  }
  0x3a   :  { %v85_v36 = vor.u32 %v84_v29, %v83_v22  ;;  %v88_v37 = vor.u32 %v87_v31, %v86_v24  ;;  %v163_v24 = vlaneseq  ;;  %v173_v28 = vunpack.c.l.s4 %v316_v27 }
  0x3b   :  { %v93_v38 = vsel %vm89_vm1, %v73_v25, %v76_v33  ;;  %v94_v39 = vsel %vm92_vm2, %v82_v35, 2102212464  ;;  %v97_v40 = vsel %vm89_vm1, %v76_v33, %v79_v34  ;;  %v101_v41 = vsel %vm89_vm1, %v79_v34, %v82_v35 }
  0x3c   :  { %v95_v42 = vsel %vm91_vm4, %v79_v34, %v94_v39  ;;  %v98_v43 = vsel %vm92_vm2, %v85_v36, 920167782  ;;  %v102_v44 = vsel %vm92_vm2, %v88_v37, 1326507024  ;;  %v164_v26 = vshrl.u32 %v163_v24, 7 }
  0x3d   :  { %v99_v45 = vsel %vm91_vm4, %v82_v35, %v98_v43  ;;  %v103_v46 = vsel %vm91_vm4, %v85_v36, %v102_v44  ;;  %v96_v47 = vsel %vm90_vm3, %v93_v38, %v95_v42  ;;  %v174_v35 = vunpack.c.0.s8 %v173_v28  ;;  %v161_v43 = vld [vmem:[#allocation7] sm:$0xf] }
  0x3e   :  { %v100_v48 = vsel %vm90_vm3, %v97_v40, %v99_v45  ;;  %v104_v49 = vsel %vm90_vm3, %v101_v41, %v103_v46  ;;  %v112_v54 = vmul.u32 %v105_v32, %v96_v47  ;;  %v169_v34 = vsub.s32 1, %v164_v26 }
  0x3f   :  { %v353_v50 = vmul.u32.u64.low %v105_v32, %v104_v49  ;;  %v354_v51 = vmul.u32.u64.high %v105_v32, %v104_v49, %v353_v50  ;;  %v356_v52 = vmul.u32.u64.low %v105_v32, %v100_v48  ;;  %v357_v53 = vmul.u32.u64.high %v105_v32, %v100_v48, %v356_v52 }
  0x40   :  { %v165_v32 = vsub.s32 0, %v164_v26  ;;  %v177_v41 = vsub.s32 %v174_v35, %v164_v26 }
  0x41   :  { %vm114_vm5 = vc.u32 %v354_v51, %v356_v52  ;;  %v115_v55 = vadd.s32 1, %v357_v53  ;;  %v113_v2 = vadd.s32 %v356_v52, %v354_v51 }
  0x43   :  { %v116_v56 = vsel %vm114_vm5, %v115_v55, %v357_v53 }
  0x44   :  { %v117_v57 = vadd.s32 %v116_v56, %v112_v54 }
  0x46   :  { %v118_v58 = vadd.s32 536870912, %v117_v57 }
  0x48   :  { %v119_v59 = vshrl.u32 %v118_v58, 30 }
  0x4a   :  { %v120_v60 = vshll.u32 %v119_v59, 30  ;;  %v143_v17 = vsub.s32 4, %v119_v59 }
  0x4c   :  { %v121_v61 = vsub.s32 %v117_v57, %v120_v60  ;;  %v144_v20 = vsel %vm59_vm7, %v143_v17, %v119_v59 }
  0x4d   :  { %v146_v22 = vsel %vm58_vm8, 0, %v144_v20 }
  0x4e   :  { %v123_v62 = vsub.s32 0, %v121_v61  ;;  %v150_v23 = vadd.s32 3, %v146_v22 }
  0x50   :  { %v199_v63 = vmin.u32 %v123_v62, %v121_v61  ;;  %v151_v25 = vand.u32 3, %v150_v23 }
  0x52   :  { %v125_v0 = vclz %v199_v63  ;;  %vm156_vm9 = vcmp.eq.s32.totalorder %v151_v25, 2  ;;  %vm153_vm10 = vcmp.eq.s32.totalorder %v151_v25, 0  ;;  %vm152_vm11 = vcmp.lt.s32.totalorder %v151_v25, 2 }
  0x54   :  { %v200_v1 = vadd.s32 4294967294, %v125_v0 }
  0x56   :  { %vm201_vm6 = vcmp.lt.s32.totalorder %v200_v1, 0 }
  0x57   :  { %v128_v4 = vsel %vm201_vm6, 0, %v200_v1 }
  0x58   :  { %v129_v5 = vsub.s32 32, %v128_v4  ;;  %v130_v7 = vshll.u32 %v121_v61, %v128_v4  ;;  %v133_v8 = vsub.s32 4294967266, %v128_v4 }
  0x5a   :  { %v131_v9 = vshrl.u32 %v113_v2, %v129_v5  ;;  %v134_v10 = vadd.s32 127, %v133_v8 }
  0x5c   :  { %v132_v11 = vor.u32 %v131_v9, %v130_v7  ;;  %v135_v12 = vshll.u32 %v134_v10, 23 }
  0x5e   :  { %v136_v13 = vor.u32 4788187, %v135_v12  ;;  %v139_v14 = vcvt.s32.f32 %v132_v11 }
  0x60   :  { %v137_v15 = vand.u32 2147483647, %v136_v13 }
  0x62   :  { %v140_v16 = vmul.f32 %v139_v14, %v137_v15 }
  0x64   :  { %v141_v18 = vxor.u32 2147483648, %v140_v16 }
  0x66   :  { %v142_v19 = vsel %vm59_vm7, %v141_v18, %v140_v16 }
  0x67   :  { %v145_v21 = vsel %vm58_vm8, %v347_v3, %v142_v19 }
  0x68   :  { %217 = vcosq.f32 %v145_v21 }
  0x69   :  { %219 = vsinq.f32 %v145_v21 }
  0x75   :  { %v218_v29 = vpop.eup %217 }
  0x76   :  { %v220_v30 = vpop.eup %219  ;;  %v157_v31 = vxor.u32 2147483648, %v218_v29 }
  0x77   :  { %v154_v6 = vxor.u32 2147483648, %v220_v30 }
  0x78   :  { %v158_v33 = vsel %vm156_vm9, %v157_v31, %v220_v30 }
  0x79   :  { %v155_v36 = vsel %vm153_vm10, %v218_v29, %v154_v6 }
  0x7a   :  { %v159_v37 = vsel %vm152_vm11, %v155_v36, %v158_v33 }
  0x7b   :  { %v160_v38 = vsel %vm149_vm12, nan, %v159_v37 }
  0x7c   :  { %v166_v39 = vrot.slane %v160_v38, %v165_v32  ;;  %v170_v40 = vrot.slane %v160_v38, %v169_v34 }
  0x7e   :  { %v171_v42 = vcombine.low %v166_v39, %v170_v40 }
  0x80   :  { %v178_v44 = vrot.slane %v171_v42, %v177_v41 }
  0x82   :  { %v180_v45 = vadd.f32 %v178_v44, %v161_v43 }
  0x84   :  { %181 = vst [vmem:[#allocation8] sm:$0xf] %v180_v45 }
  0x85   :  { %292 = shalt.err (!%p289_p5)
}
  0x86   :  { %191 = dma.vmem_to_hbm [thread:$0]  %s189_s2, 64, %s374_s3, [#allocation4]  }
  0x87   :  { %305 = dma.done.wait [#allocation4], 64  }
  0x88   :  { %306 = vsyncadd [#allocation4], 4294967232 }
  0x89   :  { %195 = vsyncpa [#allocation3], 1 }
  0x8a   :  { %196 = vsyncpa [#allocation6], 1 }
  0x8b   :  { %197 = vsyncpa [#allocation4], 1 }

</bundles_post_ra>
